<compile_context>
chip_gen: v7x
topology: tpu7x:2x2x1
jax: 0.10.0
libtpu: 0.0.40
codegen_flags: <defaults>
</compile_context>

<pallas_src>
import jax
import jax.numpy as jnp
from jax.experimental import pallas as pl
from jax.experimental.pallas import tpu as pltpu


def _imagenorm_kernel(x_ref, sb_ref, o_ref):
    # x_ref / o_ref: (br, bc) VMEM tiles.  sb_ref: (br, 2) per-row constants,
    # column 0 = scale (1/std), column 1 = bias (-mean/std); broadcast over lanes.
    x = jnp.clip(x_ref[...], 0.0, 1.0)
    scale = sb_ref[:, 0:1]
    bias = sb_ref[:, 1:2]
    o_ref[...] = x * scale + bias


_TILE_BYTES = 2 << 20  # ~2 MiB per-buffer target (measured ~85% HBM roofline regime)


def _round_down(x, m):
    return (x // m) * m


def _round_up(x, m):
    return ((x + m - 1) // m) * m


def _pick_blocks(rows, cols):
    """Pick (br, bc, grid).  Lane-dense, VMEM-budgeted, cdiv grid (partial
    trailing blocks are masked by Pallas)."""
    bytes_per_row = cols * 4

    # Row block: multiple of 8 (or the full extent when rows <= 8 / tile fits).
    if rows <= 8:
        br = rows
    else:
        br = max(8, _round_down(_TILE_BYTES // max(bytes_per_row, 1), 8))
        if br >= rows:
            br = rows

    # Prefer full rows (contiguous DMA, unmasked full-lane stores) up to 4 MiB
    # per buffer; fall back to lane-dense column blocking for huge images.
    if br * bytes_per_row <= 2 * _TILE_BYTES:
        bc = cols
    else:
        if rows > 8:
            br = 8
        bc = max(128, _round_down(_TILE_BYTES // (br * 4), 128))
        if bc >= cols:
            bc = cols

    grid_r = pl.cdiv(rows, br)
    grid_c = pl.cdiv(cols, bc)

    # Make sure v7x's second TensorCore has work: force >=2 blocks along a
    # parallel axis when the problem is big enough (no-op on v5e/v6e).
    if grid_r == 1 and grid_c == 1:
        if rows >= 16:
            br = _round_up(pl.cdiv(rows, 2), 8)
            grid_r = pl.cdiv(rows, br)
        elif cols >= 256:
            bc = _round_up(pl.cdiv(cols, 2), 128)
            grid_c = pl.cdiv(cols, bc)

    return br, bc, (grid_r, grid_c)


def image_norm(x, mean, std):
    """x: (N, 3, H, W) float32; mean / std: (3,) float32."""
    N, C, H, W = x.shape
    assert C == mean.shape[0] == std.shape[0]

    rows, cols = N * C, H * W
    x2 = x.reshape(rows, cols)  # free layout plumbing: lane axis = H*W

    # Per-row [scale, bias] constants: row n*C + c -> channel c.
    scale = (1.0 / std).astype(jnp.float32)
    bias = (-mean.astype(jnp.float32)) * scale
    sb = jnp.stack([scale, bias], axis=-1)  # (C, 2)
    sb_rows = jnp.tile(sb, (N, 1))          # (rows, 2)

    br, bc, grid = _pick_blocks(rows, cols)

    out2 = pl.pallas_call(
        _imagenorm_kernel,
        out_shape=jax.ShapeDtypeStruct((rows, cols), jnp.float32),
        grid_spec=pltpu.PrefetchScalarGridSpec(
            num_scalar_prefetch=0,
            grid=grid,
            in_specs=[
                pl.BlockSpec((br, bc), lambda r, c: (r, c)),
                # Columns vary fastest, so this block index is constant across
                # the inner grid axis and Pallas skips re-fetching it.
                pl.BlockSpec((br, 2), lambda r, c: (r, 0)),
            ],
            out_specs=pl.BlockSpec((br, bc), lambda r, c: (r, c)),
        ),
        compiler_params=pltpu.CompilerParams(
            dimension_semantics=("parallel", "parallel"),
            vmem_limit_bytes=32 << 20,
        ),
        cost_estimate=pl.CostEstimate(
            flops=4 * rows * cols,
            transcendentals=0,
            bytes_accessed=8 * rows * cols + 8 * rows,
        ),
    )(x2, sb_rows)

    return out2.reshape(N, C, H, W)


if __name__ == "__main__":
    key = jax.random.PRNGKey(0)

    # Deterministic "ImageNet-style" normalization constants (module __init__ args).
    mean = jnp.array([0.485, 0.456, 0.406], dtype=jnp.float32)
    std = jnp.array([0.229, 0.224, 0.225], dtype=jnp.float32)

    # Small NCHW input; values outside [0,1] so the clamp is exercised.
    x = jax.random.uniform(key, (2, 3, 16, 16), dtype=jnp.float32,
                           minval=-0.5, maxval=1.5)

    out = image_norm(x, mean, std)
    jax.block_until_ready(out)

    # Pure-JAX reference check (same math as the PyTorch forward).
    ref = (jnp.clip(x, 0.0, 1.0) - mean[None, :, None, None]) / std[None, :, None, None]
    assert jnp.allclose(out, ref, atol=1e-5, rtol=1e-5), "mismatch vs reference"

    print("KERNEL_OK")
</pallas_src>

<mosaic_0001>
module attributes {stable_mosaic.version = 11 : i64} {
  func.func @_imagenorm_kernel(%arg0: i32, %arg1: i32, %arg2: memref<6x128xf32, #tpu.memory_space<vmem>>, %arg3: memref<6x2xf32, #tpu.memory_space<vmem>>, %arg4: memref<6x128xf32, #tpu.memory_space<vmem>>) attributes {dimension_semantics = [#tpu.dimension_semantics<parallel>, #tpu.dimension_semantics<parallel>], iteration_bounds = array<i64: 1, 2>, scalar_prefetch = 0 : i64, scratch_operands = 0 : i64, tpu.core_type = #tpu.core_type<tc>, window_params = [{transform_indices = @transform_0, window_bounds = array<i64: 6, 128>}, {transform_indices = @transform_1, window_bounds = array<i64: 6, 2>}, {transform_indices = @transform_2, window_bounds = array<i64: 6, 128>}]} {
    %c0 = arith.constant 0 : index
    %c0_0 = arith.constant 0 : index
    %0 = vector.load %arg2[%c0, %c0_0] : memref<6x128xf32, #tpu.memory_space<vmem>>, vector<6x128xf32>
    %cst = arith.constant 0.000000e+00 : f32
    %cst_1 = arith.constant 1.000000e+00 : f32
    %1 = vector.broadcast %cst : f32 to vector<6x128xf32>
    %2 = arith.maximumf %1, %0 : vector<6x128xf32>
    %3 = vector.broadcast %cst_1 : f32 to vector<6x128xf32>
    %4 = arith.minimumf %3, %2 : vector<6x128xf32>
    %c0_2 = arith.constant 0 : index
    %c0_3 = arith.constant 0 : index
    %5 = vector.load %arg3[%c0_2, %c0_3] : memref<6x2xf32, #tpu.memory_space<vmem>>, vector<6x1xf32>
    %c0_4 = arith.constant 0 : index
    %c1 = arith.constant 1 : index
    %6 = vector.load %arg3[%c0_4, %c1] : memref<6x2xf32, #tpu.memory_space<vmem>>, vector<6x1xf32>
    %7 = vector.broadcast %5 : vector<6x1xf32> to vector<6x128xf32>
    %8 = arith.mulf %4, %7 : vector<6x128xf32>
    %9 = vector.broadcast %6 : vector<6x1xf32> to vector<6x128xf32>
    %10 = arith.addf %8, %9 : vector<6x128xf32>
    %c0_5 = arith.constant 0 : index
    %c0_6 = arith.constant 0 : index
    %11 = vector.load %arg4[%c0_5, %c0_6] : memref<6x128xf32, #tpu.memory_space<vmem>>, vector<6x128xf32>
    tpu.vector_store %arg4[%c0_5, %c0_6], %10 {strides = array<i32>} : memref<6x128xf32, #tpu.memory_space<vmem>>, vector<6x128xf32>,
    return
  }
  func.func @transform_0(%arg0: i32, %arg1: i32) -> (i32, i32) {
    %c0_i32 = arith.constant 0 : i32
    return %arg0, %arg1 : i32, i32
  }
  func.func @transform_1(%arg0: i32, %arg1: i32) -> (i32, i32) {
    %c0_i32 = arith.constant 0 : i32
    %c0_i32_0 = arith.constant 0 : i32
    return %arg0, %c0_i32 : i32, i32
  }
  func.func @transform_2(%arg0: i32, %arg1: i32) -> (i32, i32) {
    %c0_i32 = arith.constant 0 : i32
    return %arg0, %arg1 : i32, i32
  }
}

</mosaic_0001>

<bundles_post_ra>
// kernel: tpu_custom_call.1
= control target key start
LH: loop header
LB: loop body
LE: loop exit
PB: predicated region body
PF: predicated region fallthrough
CT: control target
= control target key end

     0   :  { %7 = vsyncpa [#allocation3], 0  ;;  %s711_s0 = inlined_call_operand.hbm [shape: f32[6,256], index: 0, kind: input, shape index: {}]   ;;  %s712_s1 = inlined_call_operand.vmem [shape: f32[6,2], index: 1, kind: input, shape index: {}]   ;;  %s713_s2 = inlined_call_operand.hbm [shape: f32[6,256], index: 2, kind: output, shape index: {}]  }
   0x1   :  { %9 = vsyncpa [#allocation3 + $0x1], 0 }
   0x2   :  { %10 = vsyncpa [#allocation4], 0 }
   0x3   :  { %12 = vsyncpa [#allocation4 + $0x1], 0  ;;  %s536_s9 = smov 0   ;;  %s538_s10 = smov 0  }
   0x4   :  { %s540_s11 = smov 0   ;;  %s542_s12 = smov 0  }
   0x5   :  { %s544_s13 = smov 0   ;;  %s546_s14 = smov 0  }
   0x6 LB: > { %s323_s15 = sadd.s32 4294967295, %s515_s14   ;;  %s324_s16 = sadd.s32 4294967294, %s515_s14   ;;  %s515_s14 = sphi %s546_s14, %s18_s14   ;;  %s511_s13 = sphi %s544_s13, %s729_s13   ;;  %s507_s12 = sphi %s542_s12, %s728_s12   ;;  %s503_s11 = sphi %s540_s11, %s727_s11   ;;  %s499_s10 = sphi %s538_s10, %s726_s10   ;;  %s495_s9 = sphi %s536_s9, %s725_s9  }
   0x7   : > { %s27_s17 = sadd.s32 1, %s511_s13  ;;  %s39_s18 = sadd.s32 1, %s503_s11 }
   0x8   : > { %p28_p0 = scmp.ge.s32.totalorder %s27_s17, 2  ;;  %p46_p1 = scmp.ne.s32.totalorder %s503_s11, %s499_s10 }
   0x9   : > { %p47_p2 = scmp.eq.s32.totalorder %s515_s14, 0  ;;  %p52_p3 = scmp.ne.s32.totalorder %s499_s10, %s495_s9 }
   0xa   : > { %s731_s17 = smov (%p28_p0, %s27_s17), 0  ;;  %p53_p5 = scmp.eq.s32.totalorder %s323_s15, 0 }
   0xb   : > { %p577_p4 = por %p47_p2, %p46_p1  ;;  %s35_s20 = ssub.s32 %s511_s13, %s731_s17 }
   0xc   : > { %p104_p6 = scmp.eq.s32.totalorder %s323_s15, 1  ;;  %p37_p7 = scmp.eq.s32.totalorder %s35_s20, 0 }
   0xd   : > { %p583_p8 = por %p53_p5, %p52_p3  ;;  %p110_p10 = scmp.eq.s32.totalorder %s324_s16, 1 }
   0xe   : > { %p587_p9 = por %p104_p6, %p46_p1  ;;  %p349_p13 = scmp.lt.s32.totalorder %s515_s14, 2 }
   0xf   : > { %s592_s23 = scalar_select %p37_p7, %s503_s11, %s39_s18  }
  0x10   : > { %s717_s22 = scalar_select %p587_p9, 1, 0 }
  0x11   : > { %p594_p11 = por %p110_p10, %p52_p3  ;;  %s137_s25 = sand.u32 1, %s503_s11  }
  0x12   : > { %s328_s26 = sshll.u32 %s137_s25, 3  ;;  %s329_s27 = sshll.u32 %s511_s13, 7 }
  0x13   : > { %s718_s24 = scalar_select %p594_p11, 1, 0 }
  0x14   : > { %s605_s30 = scalar_lea.hbm %s711_s0, %s329_s27  ;;  %s141_s3 = scalar_lea.vmem [#allocation2], %s328_s26 }
  0x15   : > { %s150_s4 = sshll.u32 %s141_s3, 4  ;;  %p611_p0 = pnand %p349_p13, %p577_p4  ;;  %s607_s4 = int_to_ptr.vmem [resolvable:$true] %s150_s4 }
  0x16   : > { %s138_s6 = scalar_lea.sflag [#allocation3], %s137_s25  ;;  %s403_s7 = scalar_lea.hbm %s605_s30, 128 }
  0x17   : > { %p404_p3 = scmp.ne.s32.totalorder %s605_s30, %s403_s7  ;;  %p405_p5 = pneg %p611_p0 }
  0x18   : > { %s408_s16 = scalar_lea.hbm %s711_s0, 256  ;;  %p409_p4 = scmp.lt.u32.totalorder %s605_s30, %s711_s0 }
  0x19   : > { %p406_p6 = pnand %p405_p5, %p404_p3  ;;  %p410_p10 = scmp.lt.u32.totalorder %s408_s16, %s403_s7 }
  0x1a   : > { %p412_p12 = scmp.lt.u32.totalorder %s403_s7, %s605_s30 }
  0x1b   : > { %p407_p7 = pneg %p406_p6  ;;  %p411_p13 = por %p410_p10, %p409_p4 }
  0x1d   : > { %p413_p1 = por %p412_p12, %p411_p13 }
  0x1f   : > { %p414_p2 = pnand %p413_p1, %p407_p7 }
  0x21   : > { %417 = shalt.err (!%p414_p2)
}
  0x22   : > { %s418_s20 = scalar_lea.vmem %s607_s4, 128  ;;  %s517_s25 = smov [#allocation2]  }
  0x23   : > { %p419_p3 = scmp.ne.s32.totalorder %s607_s4, %s418_s20  ;;  %s423_s26 = sshll.u32 %s517_s25, 4  ;;  %s424_s26 = int_to_ptr.vmem [resolvable:$false] %s423_s26 }
  0x24   : > { %s425_s27 = scalar_lea.vmem %s424_s26, 256  ;;  %p426_p9 = scmp.lt.s32.totalorder %s607_s4, %s424_s26 }
  0x25   : > { %p421_p6 = pnand %p419_p3, %p405_p5  ;;  %p427_p4 = scmp.lt.s32.totalorder %s425_s27, %s418_s20 }
  0x27   : > { %p422_p11 = pneg %p421_p6  ;;  %p428_p10 = por %p427_p4, %p426_p9 }
  0x29   : > { %p429_p12 = pnand %p428_p10, %p422_p11 }
  0x2b   : > { %432 = shalt.err (!%p429_p12)
}
  0x2c   : > { %344 = dma.hbm_to_vmem [thread:$0]  (!%p611_p0), %s605_s30, 128, %s607_s4, %s138_s6  }
  0x2d   : > { %p720_p1 = scmp.lt.s32.totalorder %s515_s14, 3  ;;  %p721_p2 = scmp.ge.s32.totalorder %s515_s14, 1 }
  0x2f   : > { %p156_p5 = pnand %p721_p2, %p720_p1 }
  0x30   : > { %s647_s28 = sand.u32 (!%p156_p5), 1, %s499_s10  }
  0x31   : > { %159 = sbr.rel (%p156_p5) target bundleno = 208 (0xd0), region = 28  ;;  %s331_s29 = sshll.u32 (!%p156_p5), %s647_s28, 3 }
  0x32   : > { %s162_s3 = scalar_lea.sflag (!%p156_p5), [#allocation3], %s647_s28  ;;  %s165_s7 = scalar_lea.vmem (!%p156_p5), [#allocation2], %s331_s29 }
  0x38   : > { %486 = dma.done.wait (%p583_p8), %s162_s3, 128  }
  0x39   : > { %488 = vsyncadd (%p583_p8), %s162_s3, 4294967168  ;;  %v518_v0 = vmov 0   ;;  %v197_v1 = vld [vmem:[%s712_s1] sm:$0x3f]  ;;  %v519_v2 = vmov 1   ;;  %s334_s5 = sshll.u32 %s507_s12, 7 }
  0x3a   : > { %401 = vset.pattern.permute.xlu0 %v518_v0  ;;  %v194_v3 = vld [vmem:[%s165_s7] sm:$0x3f]  ;;  %s189_s21 = scalar_lea.vmem [#allocation5], %s331_s29  ;;  %s662_s16 = scalar_lea.hbm %s713_s2, %s334_s5 }
  0x3b   : > { %200 = vperm.xlu0 %401, %v197_v1   ;;  %v195_v4 = vmax.f32 %v194_v3, 0.0  ;;  %s226_s6 = sshll.u32 %s189_s21, 4  ;;  %s211_s18 = scalar_lea.sflag [#allocation4], %s647_s28  ;;  %s664_s6 = int_to_ptr.vmem [resolvable:$true] %s226_s6 }
  0x3c   : > { %s433_s19 = scalar_lea.vmem %s664_s6, 128  ;;  %p722_p9 = scmp.ne.s32.totalorder %s717_s22, 0 }
  0x3d   : > { %v196_v6 = vmin.f32 %v195_v4, 1.0  ;;  %p434_p8 = scmp.ne.s32.totalorder %s664_s6, %s433_s19  ;;  %s520_s12 = smov [#allocation5]  }
  0x3e   : > { %s437_s20 = sshll.u32 %s520_s12, 4  ;;  %s438_s20 = int_to_ptr.vmem [resolvable:$false] %s437_s20 }
  0x3f   : > { %402 = vset.pattern.permute.xlu0 %v519_v2  ;;  %p435_p11 = pnand %p434_p8, %p722_p9  ;;  %s439_s25 = scalar_lea.vmem %s438_s20, 256 }
  0x40   : > { %205 = vperm.xlu0 %402, %v197_v1   ;;  %p440_p7 = scmp.lt.s32.totalorder %s664_s6, %s438_s20  ;;  %p441_p13 = scmp.lt.s32.totalorder %s439_s25, %s433_s19 }
  0x41   : > { %p436_p0 = pneg %p435_p11 }
  0x42   : > { %p442_p3 = por %p441_p13, %p440_p7 }
  0x44   : > { %p443_p6 = pnand %p442_p3, %p436_p0 }
  0xba   : > { %v201_v5 = vpop.permute.xlu0 %200 }
  0xbb   : > { %v203_v7 = vmul.f32 %v201_v5, %v196_v6 }
  0xbf   : > { %v206_v8 = vpop.permute.xlu0 %205 }
  0xc0   : > { %v208_v9 = vadd.f32 %v206_v8, %v203_v7 }
  0xc2   : > { %209 = vst [vmem:[%s189_s21] sm:$0x3f] %v208_v9 }
  0xc3   : > { %446 = shalt.err (!%p443_p6)
}
  0xc4   : > { %s447_s26 = scalar_lea.hbm %s662_s16, 128  ;;  %s451_s29 = scalar_lea.hbm %s713_s2, 256 }
  0xc5   : > { %p448_p4 = scmp.ne.s32.totalorder %s662_s16, %s447_s26  ;;  %p452_p1 = scmp.lt.u32.totalorder %s662_s16, %s713_s2 }
  0xc6   : > { %p453_p2 = scmp.lt.u32.totalorder %s451_s29, %s447_s26  ;;  %p455_p8 = scmp.lt.u32.totalorder %s447_s26, %s662_s16 }
  0xc7   : > { %p449_p10 = pnand %p448_p4, %p722_p9 }
  0xc8   : > { %p454_p5 = por %p453_p2, %p452_p1 }
  0xc9   : > { %p450_p12 = pneg %p449_p10 }
  0xca   : > { %p456_p11 = por %p455_p8, %p454_p5 }
  0xcc   : > { %p457_p0 = pnand %p456_p11, %p450_p12 }
  0xce   : > { %460 = shalt.err (!%p457_p0)
}
  0xcf   : > { %339 = dma.vmem_to_hbm [thread:$0]  (%p722_p9), %s664_s6, 128, %s662_s16, %s211_s18  }
  0xd0 PF: > { %s238_s30 = sand.u32 1, %s495_s9   ;;  %p723_p7 = scmp.ne.s32.totalorder %s718_s24, 0 }
  0xd1   : > { %p724_p13 = scmp.ge.s32.totalorder %s515_s14, 2  ;;  %s239_s4 = scalar_lea.sflag [#allocation4], %s238_s30 }
  0xd3   : > { %p346_p3 = pnand %p724_p13, %p723_p7 }
  0xd5   : > { %490 = dma.done.wait (!%p346_p3), %s239_s4, 128  }
  0xd6   : > { %492 = vsyncadd (!%p346_p3), %s239_s4, 4294967168  ;;  %s18_s14 = sadd.s32 1, %s515_s14   ;;  %s725_s9 = smov %s499_s10 }
  0xd7   : > { %p15_p6 = scmp.ge.s32.totalorder %s18_s14, 4   ;;  %s726_s10 = smov %s503_s11 }
  0xd8   : > { %s727_s11 = smov %s592_s23  ;;  %s728_s12 = smov %s511_s13 }
  0xd9   : > { %s729_s13 = smov %s731_s17  ;;  %17 = sbr.rel (!%p15_p6) target bundleno = 6 (0x6), region = 76 }
  0xe0   :  { %244 = vsyncpa [#allocation3], 1 }
  0xe1   :  { %246 = vsyncpa [#allocation3 + $0x1], 1 }
  0xe2   :  { %247 = vsyncpa [#allocation4], 1 }
  0xe3   :  { %249 = vsyncpa [#allocation4 + $0x1], 1 }

</bundles_post_ra>
